<compile_context>
chip_gen: v7x
topology: tpu7x:2x2x1
jax: 0.10.0
libtpu: 0.0.40
codegen_flags: <defaults>
</compile_context>

<pallas_src>
import functools

import jax
import jax.numpy as jnp
from jax import lax
from jax.experimental import pallas as pl
from jax.experimental.pallas import tpu as pltpu


def _round_up(a: int, b: int) -> int:
    return -(-a // b) * b


def _vmem_budget():
    """Returns (vmem_limit_bytes, working_budget_bytes), generation-aware."""
    try:
        cap = int(getattr(pltpu.get_tpu_info(), "vmem_capacity_bytes", 64 << 20))
    except Exception:  # conservative fallback if the query is unavailable
        cap = 64 << 20
    if cap >= (100 << 20):            # v5e / v6e: 128 MiB physical VMEM
        return 100 << 20, 88 << 20
    return 56 << 20, 44 << 20         # v7x: 64 MiB physical VMEM


def _pick_tile(dim: int, cap: int, align: int) -> int:
    """Largest tile (multiple of `align`, <= cap) that minimizes the padded extent of `dim`."""
    dim_a = _round_up(max(int(dim), 1), align)
    best_key, best_t = None, align
    for t in range(cap, align - 1, -align):
        key = (_round_up(dim_a, t), -t)   # minimize pad waste first, then prefer big tiles
        if best_key is None or key < best_key:
            best_key, best_t = key, t
    return best_t


def _fc_kernel_acc(x_ref, w_ref, o_ref, acc_ref, *, act_fn):
    # x_ref: (tm, tk); w_ref: (tn, tk) PyTorch-layout weight tile; o_ref: (tm, tn).
    k = pl.program_id(2)

    @pl.when(k == 0)
    def _():
        acc_ref[...] = jnp.zeros_like(acc_ref)

    # Contract K of x with K of W (y = x @ W.T) natively on the MXU, no transpose.
    acc_ref[...] += lax.dot_general(
        x_ref[...], w_ref[...],
        dimension_numbers=(((1,), (1,)), ((), ())),
        preferred_element_type=jnp.float32,
    )

    @pl.when(k == pl.num_programs(2) - 1)
    def _():
        out = acc_ref[...]
        if act_fn is not None:
            out = act_fn(out)
        o_ref[...] = out.astype(o_ref.dtype)


def _fc_kernel_single(x_ref, w_ref, o_ref, *, act_fn):
    # Single K block: skip the accumulator scratch entirely (review item).
    out = lax.dot_general(
        x_ref[...], w_ref[...],
        dimension_numbers=(((1,), (1,)), ((), ())),
        preferred_element_type=jnp.float32,
    )
    if act_fn is not None:
        out = act_fn(out)
    o_ref[...] = out.astype(o_ref.dtype)


_ACTIVATIONS = {"relu": lambda x: jnp.maximum(x, 0.0)}


class FullyConnectedLayer:
    """JAX/Pallas port of the PyTorch module.

    Weight padding/casting is amortized at construction (one HBM pass, ever), never per call.
    """

    def __init__(self, weight, activation=None, *, compute_dtype=None):
        weight = jnp.asarray(weight)
        assert weight.ndim == 2, "weight must be (out_features, in_features)"
        self.out_features, self.in_features = map(int, weight.shape)
        self.activation = activation
        self.compute_dtype = compute_dtype

        self._vmem_limit, self._budget = _vmem_budget()
        big_vmem = self._budget >= (80 << 20)

        if compute_dtype is not None and weight.dtype != jnp.dtype(compute_dtype):
            weight = weight.astype(compute_dtype)          # one-time cast, amortized
        elem = jnp.dtype(weight.dtype).itemsize
        self._elem_bytes = elem
        self._m_align = max(8, 32 // elem)                 # 8 f32, 16 bf16, 32 8-bit

        # Weight-side tile caps, generation-aware (bigger tiles => fewer grid steps and
        # fewer operand re-reads on this HBM-bound op).
        if elem >= 4:        # f32
            tn_cap, tk_cap = (2048, 2048) if big_vmem else (1024, 1024)
        else:                # bf16 and narrower
            tn_cap, tk_cap = (2048, 2048) if big_vmem else (2048, 1024)
        self.tn = _pick_tile(self.out_features, tn_cap, 128)
        self.tk = _pick_tile(self.in_features, tk_cap, 128)
        self._tm_cap = 1024  # grow tm aggressively with batch to cut weight re-streaming

        self.Np = _round_up(self.out_features, self.tn)
        self.Kp = _round_up(self.in_features, self.tk)
        if (self.Np, self.Kp) != tuple(weight.shape):
            weight = jnp.pad(weight, ((0, self.Np - self.out_features),
                                      (0, self.Kp - self.in_features)))
        self.weight = weight  # padded, compute-dtype weight stored once

    def __call__(self, x, activation=None):
        # NOTE: the original PyTorch forward() ignores its `activation` argument and only
        # uses self.activation; mirrored here for identical semantics.
        del activation
        x = jnp.asarray(x)
        assert x.ndim == 2 and x.shape[1] == self.in_features
        B = int(x.shape[0])
        out_dtype = x.dtype
        if self.compute_dtype is not None and x.dtype != jnp.dtype(self.compute_dtype):
            x = x.astype(self.compute_dtype)

        act = self.activation
        if act is None:
            act_fn = None
        elif isinstance(act, str):
            act_fn = _ACTIVATIONS[act]
        else:
            act_fn = act
        # TODO(synk): only elementwise activations are safe to fuse over padded tiles;
        # apply axis-wise activations (e.g. softmax) outside the kernel instead.

        m_align = self._m_align
        elem = self._elem_bytes
        ob = jnp.dtype(out_dtype).itemsize

        tm = _pick_tile(B, self._tm_cap, m_align)
        tn, tk = self.tn, self.tk
        Np, Kp = self.Np, self.Kp
        Mp = _round_up(_round_up(B, m_align), tm)

        # v7x megacore: ensure at least one "parallel" axis has >= 2 blocks.
        if Mp // tm == 1 and Np // tn == 1 and tn % 256 == 0:
            tn //= 2

        # Worst-case VMEM footprint (double-buffered inputs/outputs + f32 accumulator);
        # shrink tiles if we would exceed the generation's budget.
        def _usage(tm_, tn_, tk_):
            acc = tm_ * tn_ * 4 if Kp // tk_ > 1 else 0
            return 2 * (tm_ * tk_ + tn_ * tk_) * elem + acc + 2 * tm_ * tn_ * ob

        while _usage(tm, tn, tk) > self._budget:
            if tm > m_align:
                tm = max(m_align, _round_up(tm // 2, m_align))
            elif tn % 256 == 0:
                tn //= 2
            elif tk % 256 == 0:
                tk //= 2
            else:
                break
        Mp = _round_up(_round_up(B, m_align), tm)

        if (Mp, Kp) != tuple(x.shape):
            x = jnp.pad(x, ((0, Mp - B), (0, Kp - x.shape[1])))   # zero K-pad is exact

        n_k = Kp // tk
        cost = pl.CostEstimate(
            flops=2 * Mp * Np * Kp,
            transcendentals=0,
            bytes_accessed=Mp * Kp * elem + Np * Kp * elem + Mp * Np * ob,
        )

        if n_k == 1:
            kernel = functools.partial(_fc_kernel_single, act_fn=act_fn)
            out_p = pl.pallas_call(
                kernel,
                out_shape=jax.ShapeDtypeStruct((Mp, Np), out_dtype),
                grid=(Mp // tm, Np // tn),
                in_specs=[
                    pl.BlockSpec((tm, tk), lambda i, j: (i, 0)),
                    pl.BlockSpec((tn, tk), lambda i, j: (j, 0)),
                ],
                out_specs=pl.BlockSpec((tm, tn), lambda i, j: (i, j)),
                compiler_params=pltpu.CompilerParams(
                    dimension_semantics=("parallel", "parallel"),
                    vmem_limit_bytes=self._vmem_limit,
                ),
                cost_estimate=cost,
            )(x, self.weight)
        else:
            kernel = functools.partial(_fc_kernel_acc, act_fn=act_fn)
            out_p = pl.pallas_call(
                kernel,
                out_shape=jax.ShapeDtypeStruct((Mp, Np), out_dtype),
                grid=(Mp // tm, Np // tn, n_k),
                in_specs=[
                    pl.BlockSpec((tm, tk), lambda i, j, k: (i, k)),
                    pl.BlockSpec((tn, tk), lambda i, j, k: (j, k)),
                ],
                out_specs=pl.BlockSpec((tm, tn), lambda i, j, k: (i, j)),
                scratch_shapes=[pltpu.VMEM((tm, tn), jnp.float32)],
                compiler_params=pltpu.CompilerParams(
                    dimension_semantics=("parallel", "parallel", "arbitrary"),
                    vmem_limit_bytes=self._vmem_limit,
                ),
                cost_estimate=cost,
            )(x, self.weight)

        if Mp != B or Np != self.out_features:
            out_p = out_p[:B, :self.out_features]
        return out_p


def fully_connected(x, weight, activation=None, *, compute_dtype=None):
    """One-off functional form.  NOTE: this pads/casts the weight per call; for repeated use
    construct FullyConnectedLayer once so the weight prep is amortized."""
    return FullyConnectedLayer(weight, activation, compute_dtype=compute_dtype)(x)


if __name__ == "__main__":
    # Small shapes consistent with the module's forward pass.
    batch = 8
    in_features = 32
    out_features = 64

    key = jax.random.PRNGKey(0)
    k_x, k_w, k_x2, k_w2 = jax.random.split(key, 4)

    # Deterministic init mimicking nn.Linear default: U(-1/sqrt(in), 1/sqrt(in)), no bias.
    bound = 1.0 / jnp.sqrt(jnp.float32(in_features))
    weight = jax.random.uniform(
        k_w, (out_features, in_features), dtype=jnp.float32, minval=-bound, maxval=bound
    )
    x = jax.random.normal(k_x, (batch, in_features), dtype=jnp.float32)

    ref = x @ weight.T
    ref_relu = jnp.maximum(ref, 0.0)

    # f32 path: no activation, and fused relu.
    layer = FullyConnectedLayer(weight, activation=None)
    layer_relu = FullyConnectedLayer(weight, activation="relu")
    y = layer(x)
    y_relu = layer_relu(x)
    jax.block_until_ready((y, y_relu))
    assert y.shape == (batch, out_features) and y.dtype == x.dtype
    assert jnp.allclose(y, ref, atol=1e-5, rtol=1e-5)
    assert jnp.allclose(y_relu, ref_relu, atol=1e-5, rtol=1e-5)

    # bf16 weight-streaming path (weight cast once at init, f32 accumulate, cast back).
    layer_bf16 = FullyConnectedLayer(weight, activation=None, compute_dtype=jnp.bfloat16)
    y_bf16 = layer_bf16(x)
    jax.block_until_ready(y_bf16)
    assert y_bf16.dtype == x.dtype
    assert jnp.allclose(y_bf16, ref, atol=5e-2, rtol=5e-2)

    # Ragged shapes + callable activation: exercises zero K-padding and M/N slicing.
    x2 = jax.random.normal(k_x2, (5, 33), dtype=jnp.float32)
    w2 = jax.random.uniform(k_w2, (70, 33), dtype=jnp.float32, minval=-0.2, maxval=0.2)
    layer2 = FullyConnectedLayer(w2, activation=jnp.tanh)
    y2 = layer2(x2)
    jax.block_until_ready(y2)
    ref2 = jnp.tanh(x2 @ w2.T)
    assert y2.shape == (5, 70)
    assert jnp.allclose(y2, ref2, atol=1e-5, rtol=1e-5)

    print("KERNEL_OK")
</pallas_src>

<mosaic_0001>
module attributes {stable_mosaic.version = 11 : i64} {
  func.func @_fc_kernel_single(%arg0: i32, %arg1: i32, %arg2: memref<8x128xf32, #tpu.memory_space<vmem>>, %arg3: memref<128x128xf32, #tpu.memory_space<vmem>>, %arg4: memref<8x128xf32, #tpu.memory_space<vmem>>) attributes {dimension_semantics = [#tpu.dimension_semantics<parallel>, #tpu.dimension_semantics<parallel>], iteration_bounds = array<i64: 1, 1>, scalar_prefetch = 0 : i64, scratch_operands = 0 : i64, tpu.core_type = #tpu.core_type<tc>, window_params = [{transform_indices = @transform_0, window_bounds = array<i64: 8, 128>}, {transform_indices = @transform_1, window_bounds = array<i64: 128, 128>}, {transform_indices = @transform_2, window_bounds = array<i64: 8, 128>}]} {
    %c0 = arith.constant 0 : index
    %c0_0 = arith.constant 0 : index
    %0 = vector.load %arg2[%c0, %c0_0] : memref<8x128xf32, #tpu.memory_space<vmem>>, vector<8x128xf32>
    %c0_1 = arith.constant 0 : index
    %c0_2 = arith.constant 0 : index
    %1 = vector.load %arg3[%c0_1, %c0_2] : memref<128x128xf32, #tpu.memory_space<vmem>>, vector<128x128xf32>
    %cst = arith.constant dense<0.000000e+00> : vector<8x128xf32>
    %2 = tpu.matmul %0, %1, %cst {dimension_numbers = #tpu.dot_dimension_numbers<[1], [1], [0], [0], [0, 0, 1, 0], [], []>} : vector<8x128xf32>, vector<128x128xf32>, vector<8x128xf32> -> vector<8x128xf32>
    %c0_3 = arith.constant 0 : index
    %c0_4 = arith.constant 0 : index
    %3 = vector.load %arg4[%c0_3, %c0_4] : memref<8x128xf32, #tpu.memory_space<vmem>>, vector<8x128xf32>
    tpu.vector_store %arg4[%c0_3, %c0_4], %2 {strides = array<i32>} : memref<8x128xf32, #tpu.memory_space<vmem>>, vector<8x128xf32>,
    return
  }
  func.func @transform_0(%arg0: i32, %arg1: i32) -> (i32, i32) {
    %c0_i32 = arith.constant 0 : i32
    %c0_i32_0 = arith.constant 0 : i32
    return %arg0, %c0_i32 : i32, i32
  }
  func.func @transform_1(%arg0: i32, %arg1: i32) -> (i32, i32) {
    %c0_i32 = arith.constant 0 : i32
    %c0_i32_0 = arith.constant 0 : i32
    return %arg1, %c0_i32 : i32, i32
  }
  func.func @transform_2(%arg0: i32, %arg1: i32) -> (i32, i32) {
    %c0_i32 = arith.constant 0 : i32
    return %arg0, %arg1 : i32, i32
  }
}

</mosaic_0001>

<bundles_post_ra>
// kernel: tpu_custom_call.1
= control target key start
LH: loop header
LB: loop body
LE: loop exit
PB: predicated region body
PF: predicated region fallthrough
CT: control target
= control target key end

     0   :  { %7 = vsyncpa [#allocation3], 0  ;;  %s364_s0 = inlined_call_operand.hbm [shape: f32[8,128], index: 0, kind: input, shape index: {}]   ;;  %s365_s1 = inlined_call_operand.hbm [shape: f32[128,128], index: 1, kind: input, shape index: {}]   ;;  %s366_s2 = inlined_call_operand.hbm [shape: f32[8,128], index: 2, kind: output, shape index: {}]  }
   0x1   :  { %8 = vsyncpa [#allocation6], 0 }
   0x2   :  { %9 = vsyncpa [#allocation4], 0  ;;  %s298_s9 = smov [#allocation2]   ;;  %s299_s11 = smov [#allocation5]  }
   0x3   :  { %s16_s10 = sshll.u32 %s298_s9, 4  ;;  %s25_s12 = sshll.u32 %s299_s11, 4  ;;  %s17_s10 = int_to_ptr.vmem [resolvable:$true] %s16_s10  ;;  %s321_s12 = int_to_ptr.vmem [resolvable:$true] %s25_s12 }
   0x4   :  { %s226_s15 = scalar_lea.hbm %s364_s0, 128 }
   0x5   :  { %p227_p0 = scmp.ne.s32.totalorder %s364_s0, %s226_s15  ;;  %p230_p1 = scmp.lt.u32.totalorder %s226_s15, %s364_s0 }
   0x7   :  { %p232_p2 = pnand %p230_p1, %p227_p0 }
   0x9   :  { %235 = shalt.err (!%p232_p2)
}
   0xa   :  { %s236_s20 = scalar_lea.vmem %s17_s10, 128  ;;  %p241_p4 = scmp.lt.s32.totalorder %s17_s10, %s17_s10 }
   0xb   :  { %p237_p3 = scmp.ne.s32.totalorder %s17_s10, %s236_s20  ;;  %p242_p5 = scmp.lt.s32.totalorder %s236_s20, %s236_s20 }
   0xd   :  { %p243_p6 = por %p242_p5, %p241_p4 }
   0xf   :  { %p244_p7 = pnand %p243_p6, %p237_p3 }
  0x11   :  { %247 = shalt.err (!%p244_p7)
}
  0x12   :  { %19 = dma.hbm_to_vmem [thread:$0]  %s364_s0, 128, %s17_s10, [#allocation3]  }
  0x13   :  { %s248_s25 = scalar_lea.hbm %s365_s1, 2048 }
  0x14   :  { %p249_p8 = scmp.ne.s32.totalorder %s365_s1, %s248_s25  ;;  %p252_p9 = scmp.lt.u32.totalorder %s248_s25, %s365_s1 }
  0x16   :  { %p254_p10 = pnand %p252_p9, %p249_p8 }
  0x18   :  { %257 = shalt.err (!%p254_p10)
}
  0x19   :  { %s258_s30 = scalar_lea.vmem %s321_s12, 2048  ;;  %p263_p12 = scmp.lt.s32.totalorder %s321_s12, %s321_s12 }
  0x1a   :  { %p259_p11 = scmp.ne.s32.totalorder %s321_s12, %s258_s30  ;;  %p264_p13 = scmp.lt.s32.totalorder %s258_s30, %s258_s30 }
  0x1c   :  { %p265_p0 = por %p264_p13, %p263_p12 }
  0x1e   :  { %p266_p1 = pnand %p265_p0, %p259_p11 }
  0x20   :  { %269 = shalt.err (!%p266_p1)
}
  0x21   :  { %s300_s0 = smov 128   ;;  %s301_s3 = smov 8  }
  0x22   :  { %31 = dma.hbm_to_vmem [thread:$0]  %s365_s1, 2048, %s321_s12, [#allocation6], %s300_s0, %s300_s0, %s301_s3  }
  0x23   :  { %292 = dma.done.wait [#allocation3], 128  }
  0x24   :  { %293 = vsyncadd [#allocation3], 4294967168 }
  0x25   :  { %294 = dma.done.wait [#allocation6], 2048  }
  0x26   :  { %295 = vsyncadd [#allocation6], 4294965248  ;;  %v302_v0 = vmov 0.0|0.0   ;;  %vm303_vm0 = vmmov 0   ;;  %v304_v1 = vmov 0.0   ;;  %v39_v2 = vld [vmem:[#allocation5] sm:$0xff] }
  0x27   :  { %194 = vmatprep.subr.bf16.mxu0 %v302_v0  ;;  %191 = vmatprep.mubr.msk.f32.mxu0 %vm303_vm0, %v304_v1  ;;  %v40_v3 = vld [vmem:[#allocation5 + $0x8] sm:$0xff]  ;;  %v41_v5 = vld [vmem:[#allocation5 + $0x10] sm:$0xff]  ;;  %v42_v6 = vld [vmem:[#allocation5 + $0x18] sm:$0xff]  ;;  %s305_s1 = smov [#allocation7]  }
  0x28   :  { %v195_v4 = vpack.c.bf16 %v40_v3, %v39_v2  ;;  %v198_v7 = vpack.c.bf16 %v42_v6, %v41_v5  ;;  %v43_v8 = vld [vmem:[#allocation5 + $0x20] sm:$0xff]  ;;  %v44_v9 = vld [vmem:[#allocation5 + $0x28] sm:$0xff]  ;;  %v45_v11 = vld [vmem:[#allocation5 + $0x30] sm:$0xff]  ;;  %s132_s6 = sshll.u32 %s305_s1, 4  ;;  %s133_s6 = int_to_ptr.vmem [resolvable:$true] %s132_s6 }
  0x29   :  { %v201_v10 = vpack.c.bf16 %v44_v9, %v43_v8  ;;  %v46_v12 = vld [vmem:[#allocation5 + $0x38] sm:$0xff]  ;;  %v47_v14 = vld [vmem:[#allocation5 + $0x40] sm:$0xff]  ;;  %v48_v15 = vld [vmem:[#allocation5 + $0x48] sm:$0xff]  ;;  %s270_s7 = scalar_lea.vmem %s133_s6, 128  ;;  %p275_p3 = scmp.lt.s32.totalorder %s133_s6, %s133_s6 }
  0x2a   :  { %196 = vmatpush3.bf16.xpose.msra.mxu0 %v195_v4  ;;  %v204_v13 = vpack.c.bf16 %v46_v12, %v45_v11  ;;  %v207_v16 = vpack.c.bf16 %v48_v15, %v47_v14  ;;  %v49_v17 = vld [vmem:[#allocation5 + $0x50] sm:$0xff]  ;;  %v50_v18 = vld [vmem:[#allocation5 + $0x58] sm:$0xff]  ;;  %v51_v20 = vld [vmem:[#allocation5 + $0x60] sm:$0xff]  ;;  %p271_p2 = scmp.ne.s32.totalorder %s133_s6, %s270_s7  ;;  %p276_p4 = scmp.lt.s32.totalorder %s270_s7, %s270_s7 }
  0x2b   :  { %197 = vmatprep.subr.bf16.mxu0 %v302_v0  ;;  %v210_v19 = vpack.c.bf16 %v50_v18, %v49_v17  ;;  %v52_v21 = vld [vmem:[#allocation5 + $0x68] sm:$0xff]  ;;  %v53_v23 = vld [vmem:[#allocation5 + $0x70] sm:$0xff]  ;;  %v54_v24 = vld [vmem:[#allocation5 + $0x78] sm:$0xff] }
  0x2c   :  { %v213_v22 = vpack.c.bf16 %v52_v21, %v51_v20  ;;  %v216_v25 = vpack.c.bf16 %v54_v24, %v53_v23  ;;  %v38_v26 = vld [vmem:[#allocation2] sm:$0xff]  ;;  %p277_p5 = por %p276_p4, %p275_p3 }
  0x2e   :  { %p278_p6 = pnand %p277_p5, %p271_p2 }
  0x32   :  { %199 = vmatpush3.bf16.xpose.msra.mxu0 %v198_v7 }
  0x33   :  { %200 = vmatprep.subr.bf16.mxu0 %v302_v0 }
  0x3a   :  { %202 = vmatpush3.bf16.xpose.msra.mxu0 %v201_v10 }
  0x3b   :  { %203 = vmatprep.subr.bf16.mxu0 %v302_v0 }
  0x42   :  { %205 = vmatpush3.bf16.xpose.msra.mxu0 %v204_v13 }
  0x43   :  { %206 = vmatprep.subr.bf16.mxu0 %v302_v0 }
  0x4a   :  { %208 = vmatpush3.bf16.xpose.msra.mxu0 %v207_v16 }
  0x4b   :  { %209 = vmatprep.subr.bf16.mxu0 %v302_v0 }
  0x52   :  { %211 = vmatpush3.bf16.xpose.msra.mxu0 %v210_v19 }
  0x53   :  { %212 = vmatprep.subr.bf16.mxu0 %v302_v0 }
  0x5a   :  { %214 = vmatpush3.bf16.xpose.msra.mxu0 %v213_v22 }
  0x5b   :  { %215 = vmatprep.subr.bf16.mxu0 %v302_v0 }
  0x62   :  { %217 = vmatpush3.bf16.xpose.msra.mxu0 %v216_v25 }
  0x69   :  { %192 = vmatmul.mubr.f32.vlgmr.msra.gmra.mrb[0].mxu0 %v38_v26 }
 0x13c   :  { %v121_v27 = vpop.f32.mrb[0].mxu0 }
 0x13d   :  { %125 = vst [vmem:[#allocation7] sm:$0xff] %v121_v27  ;;  %v193_v28 = vpop.f32.mrb[1].mxu0 }
 0x13e   :  { %281 = shalt.err (!%p278_p6)
}
 0x13f   :  { %s282_s10 = scalar_lea.hbm %s366_s2, 128 }
 0x140   :  { %p283_p7 = scmp.ne.s32.totalorder %s366_s2, %s282_s10  ;;  %p286_p8 = scmp.lt.u32.totalorder %s282_s10, %s366_s2 }
 0x142   :  { %p288_p9 = pnand %p286_p8, %p283_p7 }
 0x144   :  { %291 = shalt.err (!%p288_p9)
}
 0x145   :  { %135 = dma.vmem_to_hbm [thread:$0]  %s133_s6, 128, %s366_s2, [#allocation4]  }
 0x146   :  { %296 = dma.done.wait [#allocation4], 128  }
 0x147   :  { %297 = vsyncadd [#allocation4], 4294967168 }
 0x148   :  { %139 = vsyncpa [#allocation3], 1 }
 0x149   :  { %140 = vsyncpa [#allocation6], 1 }
 0x14a   :  { %141 = vsyncpa [#allocation4], 1 }

</bundles_post_ra>
